<compile_context>
chip_gen: v7x
topology: tpu7x:2x2x1
jax: 0.10.0
libtpu: 0.0.40
codegen_flags: <defaults>
</compile_context>

<pallas_src>
import functools

import jax
import jax.numpy as jnp
from jax.experimental import pallas as pl
from jax.experimental.pallas import tpu as pltpu


def _round_up(v, m):
    return -(-v // m) * m


# ---------------------------------------------------------------------------
# Kernels
# ---------------------------------------------------------------------------
def _loki_mm_kernel_f32out(x_ref, w_ref, b_ref, o_ref):
    """f32 output: accumulate directly into the resident output block."""
    k = pl.program_id(2)

    @pl.when(k == 0)
    def _():
        # Seed with the bias row (broadcast over rows) -> no separate epilogue.
        o_ref[...] = jnp.broadcast_to(b_ref[...], o_ref.shape)

    o_ref[...] += jnp.dot(x_ref[...], w_ref[...],
                          preferred_element_type=jnp.float32)


def _loki_mm_kernel_castout(x_ref, w_ref, b_ref, o_ref, acc_ref):
    """Non-f32 output: f32 VMEM accumulator, bias + downcast in the epilogue."""
    k = pl.program_id(2)

    @pl.when(k == 0)
    def _():
        acc_ref[...] = jnp.zeros_like(acc_ref)

    acc_ref[...] += jnp.dot(x_ref[...], w_ref[...],
                            preferred_element_type=jnp.float32)

    @pl.when(k == pl.num_programs(2) - 1)
    def _():
        o_ref[...] = (acc_ref[...] + b_ref[...]).astype(o_ref.dtype)


# ---------------------------------------------------------------------------
# One-time weight preprocessing (outside the per-forward hot path)
# ---------------------------------------------------------------------------
def prepare_loki_params(w_active, w_fixed, b_active, b_fixed,
                        active_pos, fixed_pos, *,
                        compute_dtype=jnp.bfloat16, pad_k=False):
    """Concatenate active/fixed rows, fold the output-channel permutation back
    into the weights, transpose to (K, N), pad N to a lane-dense multiple of
    128, and cast to the MXU-native compute dtype.

    Set `pad_k=True` only for very large K that is not a multiple of 128 (then
    the forward pass pads x to match); typical model shapes stay pad-free.
    Returns (wT, b_row) with wT: (K_pad, N_pad), b_row: (1, N_pad) f32.
    """
    N = w_active.shape[0] + w_fixed.shape[0]
    K = w_active.shape[1]

    perm = jnp.array(list(active_pos) + list(fixed_pos), dtype=jnp.int32)
    inv_perm = jnp.zeros((N,), jnp.int32).at[perm].set(
        jnp.arange(N, dtype=jnp.int32))

    w_cat = jnp.concatenate([w_active, w_fixed], axis=0)           # (N, K)
    if b_active is None:
        b_cat = jnp.zeros((N,), jnp.float32)
    else:
        b_cat = jnp.concatenate([b_active, b_fixed], axis=0)       # (N,)

    # Fold the column permutation into the weights: rows in ORIGINAL order.
    w_orig = w_cat[inv_perm]
    b_orig = b_cat[inv_perm]

    N_pad = _round_up(N, 128)                                       # lane-dense
    K_pad = _round_up(K, 128) if (pad_k and K % 128 != 0) else K

    wT = jnp.pad(w_orig.T, ((0, K_pad - K), (0, N_pad - N)))        # (K_pad, N_pad)
    wT = wT.astype(compute_dtype)
    b_row = jnp.pad(b_orig, (0, N_pad - N)).reshape(1, N_pad).astype(jnp.float32)
    return wT, b_row


# ---------------------------------------------------------------------------
# Generation-aware tile selection
# ---------------------------------------------------------------------------
def _physical_vmem_bytes():
    try:
        return int(pltpu.get_tpu_info().vmem_capacity_bytes)
    except Exception:
        return 64 << 20        # conservative fallback (v7x per-core VMEM)


def _select_tiles(M, K_w, N_pad, compute_dtype, out_dtype, use_scratch):
    cbytes = jnp.dtype(compute_dtype).itemsize
    obytes = jnp.dtype(out_dtype).itemsize
    phys = _physical_vmem_bytes()
    budget = int(phys * 0.40)            # headroom for compiler scratch

    # tm: MXU-sized for large M, shrink (but keep sublane-aligned) for small M.
    if M >= 512:
        tm = 512
    elif M >= 256:
        tm = 256
    else:
        tm = _round_up(M, 8)

    def _pick(dim, cap):
        for t in (1024, 512, 256, 128):
            if t <= cap and dim % t == 0:
                return t
        return dim                        # ragged/tiny: one full-dim block

    tn = _pick(N_pad, 1024)
    k_tiled = (K_w % 128 == 0)
    tk = _pick(K_w, 1024) if k_tiled else K_w   # full-K block when ragged

    def need(tm_, tn_, tk_):
        n = 2 * (tm_ * tk_ + tk_ * tn_) * cbytes    # double-buffered x / W
        n += 2 * tn_ * 4                            # bias blocks
        n += 2 * tm_ * tn_ * obytes                 # output blocks
        if use_scratch:
            n += tm_ * tn_ * 4                      # f32 accumulator scratch
        return n

    # Shrink until the pipelined working set fits the VMEM budget
    # (re-derived per generation: 128 MiB on v5e/v6e, 64 MiB on v7x).
    while need(tm, tn, tk) > budget:
        if k_tiled and tk > 128 and tk >= tn:
            tk //= 2
        elif tn > 128:
            tn //= 2
        elif tm > 8:
            tm = max(8, tm // 2)
        else:
            break

    # Megacore: ensure at least one "parallel" axis has >= 2 blocks
    # (v7x has 2 TensorCores; a 1x1 parallel grid leaves one idle).
    if -(-M // tm) == 1 and N_pad // tn < 2 and tn > 128 and tn % 2 == 0:
        tn //= 2

    vmem_limit = min(int(phys * 0.75),
                     max(32 << 20, need(tm, tn, tk) + (8 << 20)))
    return tm, tn, tk, vmem_limit


# ---------------------------------------------------------------------------
# Forward
# ---------------------------------------------------------------------------
@functools.partial(jax.jit, static_argnames=(
    "out_features", "compute_dtype", "tm", "tn", "tk", "vmem_limit",
    "use_pallas"))
def _loki_forward_impl(x, wT, b_row, *, out_features, compute_dtype,
                       tm, tn, tk, vmem_limit, use_pallas):
    B, S, K = x.shape
    M = B * S
    K_w, N_pad = wT.shape
    out_dtype = x.dtype

    # bf16 operands (MXU-native); f32 accumulation inside the kernel.
    x2d = x.reshape(M, K).astype(compute_dtype)
    if K_w != K:
        # Only when weights were K-padded at prep time (large ragged K);
        # the usual path (K % 128 == 0 or small K) does no hot-path padding.
        x2d = jnp.pad(x2d, ((0, 0), (0, K_w - K)))

    if not use_pallas:
        # Tiny problems: launch + per-grid-step overhead dominates -> XLA.
        out2d = (jnp.dot(x2d, wT, preferred_element_type=jnp.float32)
                 + b_row).astype(out_dtype)
        return out2d[:, :out_features].reshape(B, S, out_features)

    # M remainder handled by cdiv grid + masked edge blocks ([:M] is implicit
    # because out_shape uses the true M); only K padding affects the reduction.
    grid = (pl.cdiv(M, tm), N_pad // tn, pl.cdiv(K_w, tk))
    in_specs = [
        pl.BlockSpec((tm, tk), lambda i, j, k: (i, k)),
        pl.BlockSpec((tk, tn), lambda i, j, k: (k, j)),
        pl.BlockSpec((1, tn), lambda i, j, k: (0, j)),
    ]
    out_specs = pl.BlockSpec((tm, tn), lambda i, j, k: (i, j))
    compiler_params = pltpu.CompilerParams(
        dimension_semantics=("parallel", "parallel", "arbitrary"),
        vmem_limit_bytes=vmem_limit)

    if out_dtype == jnp.float32:
        # Accumulate directly into the resident f32 output block (no scratch).
        out2d = pl.pallas_call(
            _loki_mm_kernel_f32out,
            out_shape=jax.ShapeDtypeStruct((M, N_pad), jnp.float32),
            grid_spec=pltpu.PrefetchScalarGridSpec(
                num_scalar_prefetch=0, grid=grid,
                in_specs=in_specs, out_specs=out_specs),
            compiler_params=compiler_params,
        )(x2d, wT, b_row)
    else:
        out2d = pl.pallas_call(
            _loki_mm_kernel_castout,
            out_shape=jax.ShapeDtypeStruct((M, N_pad), out_dtype),
            grid_spec=pltpu.PrefetchScalarGridSpec(
                num_scalar_prefetch=0, grid=grid,
                in_specs=in_specs, out_specs=out_specs,
                scratch_shapes=[pltpu.VMEM((tm, tn), jnp.float32)]),
            compiler_params=compiler_params,
        )(x2d, wT, b_row)

    # Strip lane padding; columns are already in the original channel order.
    return out2d[:, :out_features].reshape(B, S, out_features)


def loki_linear_forward(x, wT, b_row, *, out_features,
                        compute_dtype=jnp.bfloat16, use_pallas=None):
    """x: (B, S, K); wT: (K_pad, N_pad) pre-folded weights (compute_dtype);
    b_row: (1, N_pad) f32 bias.  Returns (B, S, out_features) in x.dtype."""
    B, S, K = x.shape
    M = B * S
    K_w, N_pad = wT.shape
    out_dtype = x.dtype
    use_scratch = (out_dtype != jnp.float32)

    if use_pallas is None:
        use_pallas = (2 * M * N_pad * K_w) >= (4 << 20)

    tm, tn, tk, vmem_limit = _select_tiles(
        M, K_w, N_pad, compute_dtype, out_dtype, use_scratch)

    return _loki_forward_impl(
        x, wT, b_row,
        out_features=out_features,
        compute_dtype=jnp.dtype(compute_dtype),
        tm=tm, tn=tn, tk=tk,
        vmem_limit=int(vmem_limit),
        use_pallas=bool(use_pallas))


if __name__ == "__main__":
    # Small shapes consistent with the module's (batch, seq, features) forward.
    B, S, K, N = 2, 8, 32, 64
    active_outputs = [1, 3, 5, 7, 10, 20, 33, 60]

    active_pos = sorted(active_outputs)
    fixed_pos = [i for i in range(N) if i not in active_pos]

    # Deterministic parameter / input init (synthetic, no checkpoint).
    key = jax.random.PRNGKey(0)
    kx, kw, kb = jax.random.split(key, 3)
    x = jax.random.normal(kx, (B, S, K), dtype=jnp.float32)
    W = jax.random.normal(kw, (N, K), dtype=jnp.float32) * 0.05
    b = jax.random.normal(kb, (N,), dtype=jnp.float32) * 0.05

    w_active = W[jnp.array(active_pos)]
    w_fixed = W[jnp.array(fixed_pos)]
    b_active = b[jnp.array(active_pos)]
    b_fixed = b[jnp.array(fixed_pos)]

    # One-time weight prep: concat + permutation fold + transpose + lane pad
    # + bf16 cast (MXU-native operands; kernel accumulates in f32).
    wT, b_row = prepare_loki_params(w_active, w_fixed, b_active, b_fixed,
                                    active_pos, fixed_pos,
                                    compute_dtype=jnp.bfloat16)

    # Force the Pallas path so the kernel is exercised (auto-dispatch would
    # pick the XLA fallback at this tiny demo size).
    out = loki_linear_forward(x, wT, b_row, out_features=N,
                              compute_dtype=jnp.bfloat16, use_pallas=True)
    out = jax.block_until_ready(out)

    # Reference check (pure JAX, f32) — same math as the PyTorch forward.
    active_ref = x @ w_active.T + b_active
    fixed_ref = x @ w_fixed.T + b_fixed
    ref = jnp.zeros((B, S, N), dtype=x.dtype)
    ref = ref.at[:, :, jnp.array(active_pos)].set(active_ref)
    ref = ref.at[:, :, jnp.array(fixed_pos)].set(fixed_ref)

    assert out.shape == (B, S, N)
    assert out.dtype == x.dtype
    # bf16 operands + f32 accumulation -> tolerance scaled for bf16 rounding.
    assert jnp.allclose(out, ref, atol=1e-2, rtol=1e-2), \
        float(jnp.max(jnp.abs(out - ref)))

    print("KERNEL_OK")
</pallas_src>

<mosaic_0001>
module attributes {stable_mosaic.version = 11 : i64} {
  func.func @_loki_mm_kernel_f32out(%arg0: i32, %arg1: i32, %arg2: i32, %arg3: memref<16x32xbf16, #tpu.memory_space<vmem>>, %arg4: memref<32x128xbf16, #tpu.memory_space<vmem>>, %arg5: memref<1x128xf32, #tpu.memory_space<vmem>>, %arg6: memref<16x128xf32, #tpu.memory_space<vmem>>) attributes {dimension_semantics = [#tpu.dimension_semantics<parallel>, #tpu.dimension_semantics<parallel>, #tpu.dimension_semantics<arbitrary>], iteration_bounds = array<i64: 1, 1, 1>, scalar_prefetch = 0 : i64, scratch_operands = 0 : i64, tpu.core_type = #tpu.core_type<tc>, window_params = [{transform_indices = @transform_0, window_bounds = array<i64: 16, 32>}, {transform_indices = @transform_1, window_bounds = array<i64: 32, 128>}, {transform_indices = @transform_2, window_bounds = array<i64: 1, 128>}, {transform_indices = @transform_3, window_bounds = array<i64: 16, 128>}]} {
    %c0_i32 = arith.constant 0 : i32
    %0 = arith.cmpi eq, %arg2, %c0_i32 : i32
    %1 = arith.extui %0 : i1 to i32
    %c0_i32_0 = arith.constant 0 : i32
    %2 = arith.cmpi ne, %1, %c0_i32_0 : i32
    scf.if %2 {
      %c0_8 = arith.constant 0 : index
      %c0_9 = arith.constant 0 : index
      %9 = vector.load %arg5[%c0_8, %c0_9] : memref<1x128xf32, #tpu.memory_space<vmem>>, vector<1x128xf32>
      %10 = vector.shape_cast %9 : vector<1x128xf32> to vector<1x128xf32>
      %11 = vector.broadcast %10 : vector<1x128xf32> to vector<16x128xf32>
      %c0_10 = arith.constant 0 : index
      %c0_11 = arith.constant 0 : index
      %12 = vector.load %arg6[%c0_10, %c0_11] : memref<16x128xf32, #tpu.memory_space<vmem>>, vector<16x128xf32>
      tpu.vector_store %arg6[%c0_10, %c0_11], %11 {strides = array<i32>} : memref<16x128xf32, #tpu.memory_space<vmem>>, vector<16x128xf32>,
    } else {
    }
    %c0 = arith.constant 0 : index
    %c0_1 = arith.constant 0 : index
    %3 = vector.load %arg6[%c0, %c0_1] : memref<16x128xf32, #tpu.memory_space<vmem>>, vector<16x128xf32>
    %c0_2 = arith.constant 0 : index
    %c0_3 = arith.constant 0 : index
    %4 = vector.load %arg3[%c0_2, %c0_3] : memref<16x32xbf16, #tpu.memory_space<vmem>>, vector<16x32xbf16>
    %c0_4 = arith.constant 0 : index
    %c0_5 = arith.constant 0 : index
    %5 = vector.load %arg4[%c0_4, %c0_5] : memref<32x128xbf16, #tpu.memory_space<vmem>>, vector<32x128xbf16>
    %cst = arith.constant dense<0.000000e+00> : vector<16x128xf32>
    %6 = tpu.matmul %4, %5, %cst {dimension_numbers = #tpu.dot_dimension_numbers<[1], [0], [0], [1], [0, 0, 1, 1], [], []>} : vector<16x32xbf16>, vector<32x128xbf16>, vector<16x128xf32> -> vector<16x128xf32>
    %7 = arith.addf %3, %6 : vector<16x128xf32>
    %c0_6 = arith.constant 0 : index
    %c0_7 = arith.constant 0 : index
    %8 = vector.load %arg6[%c0_6, %c0_7] : memref<16x128xf32, #tpu.memory_space<vmem>>, vector<16x128xf32>
    tpu.vector_store %arg6[%c0_6, %c0_7], %7 {strides = array<i32>} : memref<16x128xf32, #tpu.memory_space<vmem>>, vector<16x128xf32>,
    return
  }
  func.func @transform_0(%arg0: i32, %arg1: i32, %arg2: i32) -> (i32, i32) {
    %c0_i32 = arith.constant 0 : i32
    return %arg0, %arg2 : i32, i32
  }
  func.func @transform_1(%arg0: i32, %arg1: i32, %arg2: i32) -> (i32, i32) {
    %c0_i32 = arith.constant 0 : i32
    return %arg2, %arg1 : i32, i32
  }
  func.func @transform_2(%arg0: i32, %arg1: i32, %arg2: i32) -> (i32, i32) {
    %c0_i32 = arith.constant 0 : i32
    %c0_i32_0 = arith.constant 0 : i32
    return %c0_i32, %arg1 : i32, i32
  }
  func.func @transform_3(%arg0: i32, %arg1: i32, %arg2: i32) -> (i32, i32) {
    %c0_i32 = arith.constant 0 : i32
    return %arg0, %arg1 : i32, i32
  }
}

</mosaic_0001>

<bundles_post_ra>
// kernel: _loki_forward_impl.1
= control target key start
LH: loop header
LB: loop body
LE: loop exit
PB: predicated region body
PF: predicated region fallthrough
CT: control target
= control target key end

     0   :  { %v127_v0 = vmov 0.0   ;;  %vm128_vm0 = vmmov 0   ;;  %vm53_vm1 = vcmask 261120   ;;  %s167_s1 = inlined_call_operand.vmem [shape: bf16[32,128], index: 1, kind: input, shape index: {}]   ;;  %s168_s0 = inlined_call_operand.vmem [shape: bf16[16,32], index: 0, kind: input, shape index: {}]   ;;  %s169_s2 = inlined_call_operand.vmem [shape: f32[1,128], index: 2, kind: input, shape index: {}]   ;;  %s170_s3 = inlined_call_operand.vmem [shape: f32[16,128], index: 3, kind: output, shape index: {}]  }
   0x1   :  { %114 = vmatprep.subr.bf16.mxu0 %v127_v0  ;;  %v124_v1 = vld [vmem:[%s167_s1] sm:$0xff]   ;;  %118 = vmatprep.mubr.msk.bf16.mxu0 %vm128_vm0, %v127_v0  ;;  %v125_v2 = vld [vmem:[%s167_s1 + $0x8] sm:$0xff]  }
   0x2   :  { %115 = vmatpush3.bf16.msra.mxu0 %v124_v1  ;;  %v126_v3 = vld [vmem:[%s168_s0] sm:$0xff]  }
   0x3   :  { %116 = vmatprep.subr.bf16.mxu0 %v127_v0  ;;  %v106_v4 = vld [vmem:[%s169_s2] ss:$0 sm:$0xff] }
   0x6   :  { %117 = vmatpush3.bf16.msra.mxu0 %v125_v2 }
   0x9   :  { %119 = vmatmul.mubr.msk.bf16.vlgmr.msra.gmra.mrb[0].mxu0 %vm53_vm1, %v126_v3 }
  0xdc   :  { %v91_v5 = vpop.f32.mrb[0].mxu0 }
  0xdd   :  { %v98_v6 = vadd.f32 %v106_v4, %v91_v5  ;;  %v120_v7 = vpop.f32.mrb[1].mxu0 }
  0xde   :  { %v94_v8 = vpop.f32.mrb[2].mxu0 }
  0xdf   :  { %100 = vst [vmem:[%s170_s3] sm:$0xff] %v98_v6  ;;  %v99_v9 = vadd.f32 %v106_v4, %v94_v8  ;;  %v121_v10 = vpop.f32.mrb[3].mxu0 }
  0xe1   :  { %101 = vst [vmem:[%s170_s3 + $0x8] sm:$0xff] %v99_v9 }

</bundles_post_ra>
